<compile_context>
chip_gen: v7x
topology: tpu7x:2x2x1
jax: 0.10.0
libtpu: 0.0.40
codegen_flags: <defaults>
</compile_context>

<pallas_src>
import numpy as np
import jax
import jax.numpy as jnp
from jax.experimental import pallas as pl
from jax.experimental.pallas import tpu as pltpu


_BINOMIAL_TAPS = {
    1: [1.0],
    2: [1.0, 1.0],
    3: [1.0, 2.0, 1.0],
    4: [1.0, 3.0, 3.0, 1.0],
    5: [1.0, 4.0, 6.0, 4.0, 1.0],
    6: [1.0, 5.0, 10.0, 10.0, 5.0, 1.0],
    7: [1.0, 6.0, 15.0, 20.0, 15.0, 6.0, 1.0],
}


def _binomial_1d(filt_size: int) -> np.ndarray:
    a = np.asarray(_BINOMIAL_TAPS[filt_size], np.float64)
    return a / a.sum()


def _crop_amounts(filt_size: int):
    # Exactly the module's pad_sizes (negated): ReflectionPad2d with negative pads == crop.
    p_lo = int(1.0 * (filt_size - 1) / 2)
    p_hi = int(np.ceil(1.0 * (filt_size - 1) / 2))
    return p_lo, p_hi


def _upsample_operator(n_full: int, filt_size: int, stride: int):
    """1-D transposed-conv operator M of shape (n_out, n_full), crop folded in.

    (M @ x) reproduces conv_transpose1d(x[p_lo : n_full - p_hi], g, stride) with the
    normalized binomial taps g.  Returns (M, n_out).
    """
    g = _binomial_1d(filt_size)
    p_lo, p_hi = _crop_amounts(filt_size)
    n_in = n_full - p_lo - p_hi
    assert n_in >= 1, "spatial dim too small for this filt_size"
    n_out = (n_in - 1) * stride + filt_size
    M = np.zeros((n_out, n_full), np.float64)
    for i in range(n_in):
        for k in range(filt_size):
            M[stride * i + k, i + p_lo] += g[k]
    return M.astype(np.float32), n_out


def _pick_batch_block(B: int, tb_cap: int) -> int:
    """Largest block size <= tb_cap dividing B; prefer >= 2 grid steps for megacore."""
    def best_divisor(limit):
        for tb in range(max(1, min(limit, B)), 0, -1):
            if B % tb == 0:
                return tb
        return 1

    tb = best_divisor(tb_cap)
    if tb == B and B > 1:
        tb = best_divisor(B // 2)
    return tb


def _make_aa_kernel(tb: int):
    """Per-grid-step body: tb images, each Out_i = A @ X_i @ B on the MXU (f32 accum)."""

    def kernel(a_ref, b_ref, x_ref, o_ref):
        A = a_ref[...]           # (Ho, H)      f32, resident across the whole grid
        Bc = b_ref[...]          # (W, Wo_pad)  f32, resident across the whole grid
        for i in range(tb):      # static unroll, tb is small (<= 8)
            xi = x_ref[i].astype(jnp.float32)                           # (H, W)  cast in-vreg
            t = jnp.dot(xi, Bc, preferred_element_type=jnp.float32)     # (H, Wo_pad)
            o = jnp.dot(A, t, preferred_element_type=jnp.float32)       # (Ho, Wo_pad)
            o_ref[i] = o.astype(o_ref.dtype)

    return kernel


def upsample_antialias(x, *, filt_size: int = 3, stride: int = 2, pad_off: int = 0,
                       batch_block: int = 8):
    """JAX/Pallas equivalent of UpsampleAntialias.forward (NCHW input)."""
    assert pad_off == 0, "only pad_off=0 implemented"
    N, C, H, W = x.shape

    if filt_size == 1:
        # Module's filt_size==1 branch: pure strided subsampling, no convolution.
        return x[:, :, ::stride, ::stride]

    Mh, Ho = _upsample_operator(H, filt_size, stride)   # (Ho, H)
    Mw, Wo = _upsample_operator(W, filt_size, stride)   # (Wo, W)

    # Lane-dense stores: pad output width up to a multiple of 128 with exact-zero columns.
    Wo_pad = ((Wo + 127) // 128) * 128
    Bc_np = np.zeros((W, Wo_pad), np.float32)
    Bc_np[:, :Wo] = Mw.T

    A = jnp.asarray(Mh)        # (Ho, H)      float32
    Bc = jnp.asarray(Bc_np)    # (W, Wo_pad)  float32

    B = N * C
    x3 = x.reshape(B, H, W)    # free reshape (merge of leading dims)

    # Batch-block size: amortize per-grid-step overhead while keeping the double-buffered
    # in+out blocks well under the v7x 64 MiB VMEM (128 MiB on v5e/v6e).
    itemsize = np.dtype(x.dtype).itemsize
    per_img_bytes = 2 * (H * W + Ho * Wo_pad) * itemsize
    vmem_block_budget = 16 * 1024 * 1024
    tb_cap = max(1, min(batch_block, vmem_block_budget // max(per_img_bytes, 1)))
    tb = _pick_batch_block(B, int(tb_cap))
    # TODO(synk): extremely large single feature maps (where even tb=1 exceeds the VMEM
    #             budget) would additionally need H-tiling with a (filt_size-1)-row halo.

    grid = (B // tb,)
    out_p = pl.pallas_call(
        _make_aa_kernel(tb),
        out_shape=jax.ShapeDtypeStruct((B, Ho, Wo_pad), x.dtype),
        grid=grid,
        in_specs=[
            pl.BlockSpec((Ho, H), lambda b: (0, 0)),        # row operator (resident)
            pl.BlockSpec((W, Wo_pad), lambda b: (0, 0)),    # col operator (resident)
            pl.BlockSpec((tb, H, W), lambda b: (b, 0, 0)),  # compact input block
        ],
        out_specs=pl.BlockSpec((tb, Ho, Wo_pad), lambda b: (b, 0, 0)),
        compiler_params=pltpu.CompilerParams(
            dimension_semantics=("parallel",),
            vmem_limit_bytes=48 * 1024 * 1024,   # headroom; still below v7x physical 64 MiB
        ),
    )(A, Bc, x3)

    out = out_p if Wo_pad == Wo else out_p[:, :, :Wo]
    return out.reshape(N, C, Ho, Wo)


def _reference_numpy(x: np.ndarray, filt_size: int = 3, stride: int = 2) -> np.ndarray:
    """Direct numpy transcription of crop + conv_transpose2d (groups=C, filter sums to 1)."""
    N, C, H, W = x.shape
    K = filt_size
    g = _binomial_1d(K)
    filt = (g[:, None] * g[None, :]).astype(np.float32)
    p_lo, p_hi = _crop_amounts(K)
    xc = x[:, :, p_lo:H - p_hi, p_lo:W - p_hi].astype(np.float32)
    Hp, Wp = xc.shape[2], xc.shape[3]
    Ho = (Hp - 1) * stride + K
    Wo = (Wp - 1) * stride + K
    out = np.zeros((N, C, Ho, Wo), np.float32)
    for i in range(Hp):
        for j in range(Wp):
            for kh in range(K):
                for kw in range(K):
                    out[:, :, stride * i + kh, stride * j + kw] += xc[:, :, i, j] * filt[kh, kw]
    return out


if __name__ == "__main__":
    key = jax.random.PRNGKey(0)
    k1, k2, k3 = jax.random.split(key, 3)

    # Default module config: filt_size=3, stride=2 (NCHW).
    x = jax.random.normal(k1, (2, 4, 16, 16), dtype=jnp.float32)
    out = jax.block_until_ready(upsample_antialias(x, filt_size=3, stride=2))
    ref = _reference_numpy(np.asarray(x), filt_size=3, stride=2)
    assert out.shape == ref.shape, (out.shape, ref.shape)
    np.testing.assert_allclose(np.asarray(out), ref, rtol=1e-5, atol=1e-5)

    # Non-default filter size, non-square spatial dims.
    x5 = jax.random.normal(k2, (1, 3, 12, 18), dtype=jnp.float32)
    out5 = jax.block_until_ready(upsample_antialias(x5, filt_size=5, stride=2))
    ref5 = _reference_numpy(np.asarray(x5), filt_size=5, stride=2)
    assert out5.shape == ref5.shape, (out5.shape, ref5.shape)
    np.testing.assert_allclose(np.asarray(out5), ref5, rtol=1e-5, atol=1e-5)

    # bf16 activations stay bf16 through the DMA; accumulation is f32 in-vreg.
    xb = jax.random.normal(k3, (2, 4, 16, 16), dtype=jnp.bfloat16)
    outb = jax.block_until_ready(upsample_antialias(xb, filt_size=3, stride=2))
    refb = _reference_numpy(np.asarray(xb.astype(jnp.float32)), filt_size=3, stride=2)
    assert outb.shape == refb.shape, (outb.shape, refb.shape)
    np.testing.assert_allclose(np.asarray(outb.astype(jnp.float32)), refb, rtol=1e-2, atol=1e-2)

    # filt_size == 1 branch: pure strided subsampling (no kernel needed).
    out1 = jax.block_until_ready(upsample_antialias(x, filt_size=1, stride=2))
    np.testing.assert_allclose(np.asarray(out1), np.asarray(x)[:, :, ::2, ::2], rtol=0, atol=0)

    print("KERNEL_OK")
</pallas_src>

<mosaic_0001>
module attributes {stable_mosaic.version = 11 : i64} {
  func.func @kernel(%arg0: i32, %arg1: memref<29x16xf32, #tpu.memory_space<vmem>>, %arg2: memref<16x128xf32, #tpu.memory_space<vmem>>, %arg3: memref<4x16x16xf32, #tpu.memory_space<vmem>>, %arg4: memref<4x29x128xf32, #tpu.memory_space<vmem>>) attributes {dimension_semantics = [#tpu.dimension_semantics<parallel>], iteration_bounds = array<i64: 2>, scalar_prefetch = 0 : i64, scratch_operands = 0 : i64, tpu.core_type = #tpu.core_type<tc>, window_params = [{pipeline_mode = #tpu.pipeline_mode<synchronous>, transform_indices = @transform_0, window_bounds = array<i64: 29, 16>}, {pipeline_mode = #tpu.pipeline_mode<synchronous>, transform_indices = @transform_1, window_bounds = array<i64: 16, 128>}, {transform_indices = @transform_2, window_bounds = array<i64: 4, 16, 16>}, {transform_indices = @transform_3, window_bounds = array<i64: 4, 29, 128>}]} {
    %c0 = arith.constant 0 : index
    %c0_0 = arith.constant 0 : index
    %0 = vector.load %arg1[%c0, %c0_0] : memref<29x16xf32, #tpu.memory_space<vmem>>, vector<29x16xf32>
    %c0_1 = arith.constant 0 : index
    %c0_2 = arith.constant 0 : index
    %1 = vector.load %arg2[%c0_1, %c0_2] : memref<16x128xf32, #tpu.memory_space<vmem>>, vector<16x128xf32>
    %c0_3 = arith.constant 0 : index
    %c0_4 = arith.constant 0 : index
    %c0_5 = arith.constant 0 : index
    %2 = vector.load %arg3[%c0_3, %c0_4, %c0_5] : memref<4x16x16xf32, #tpu.memory_space<vmem>>, vector<1x16x16xf32>
    %3 = vector.shape_cast %2 : vector<1x16x16xf32> to vector<16x16xf32>
    %cst = arith.constant dense<0.000000e+00> : vector<16x128xf32>
    %4 = tpu.matmul %3, %1, %cst {dimension_numbers = #tpu.dot_dimension_numbers<[1], [0], [0], [1], [0, 0, 1, 1], [], []>} : vector<16x16xf32>, vector<16x128xf32>, vector<16x128xf32> -> vector<16x128xf32>
    %cst_6 = arith.constant dense<0.000000e+00> : vector<29x128xf32>
    %5 = tpu.matmul %0, %4, %cst_6 {dimension_numbers = #tpu.dot_dimension_numbers<[1], [0], [0], [1], [0, 0, 1, 1], [], []>} : vector<29x16xf32>, vector<16x128xf32>, vector<29x128xf32> -> vector<29x128xf32>
    %c0_7 = arith.constant 0 : index
    %c0_8 = arith.constant 0 : index
    %c0_9 = arith.constant 0 : index
    %6 = vector.load %arg4[%c0_7, %c0_8, %c0_9] : memref<4x29x128xf32, #tpu.memory_space<vmem>>, vector<1x29x128xf32>
    %7 = vector.shape_cast %6 : vector<1x29x128xf32> to vector<29x128xf32>
    %8 = vector.shape_cast %5 : vector<29x128xf32> to vector<1x29x128xf32>
    tpu.vector_store %arg4[%c0_7, %c0_8, %c0_9], %8 {strides = array<i32>} : memref<4x29x128xf32, #tpu.memory_space<vmem>>, vector<1x29x128xf32>,
    %c1 = arith.constant 1 : index
    %c0_10 = arith.constant 0 : index
    %c0_11 = arith.constant 0 : index
    %9 = vector.load %arg3[%c1, %c0_10, %c0_11] : memref<4x16x16xf32, #tpu.memory_space<vmem>>, vector<1x16x16xf32>
    %10 = vector.shape_cast %9 : vector<1x16x16xf32> to vector<16x16xf32>
    %cst_12 = arith.constant dense<0.000000e+00> : vector<16x128xf32>
    %11 = tpu.matmul %10, %1, %cst_12 {dimension_numbers = #tpu.dot_dimension_numbers<[1], [0], [0], [1], [0, 0, 1, 1], [], []>} : vector<16x16xf32>, vector<16x128xf32>, vector<16x128xf32> -> vector<16x128xf32>
    %cst_13 = arith.constant dense<0.000000e+00> : vector<29x128xf32>
    %12 = tpu.matmul %0, %11, %cst_13 {dimension_numbers = #tpu.dot_dimension_numbers<[1], [0], [0], [1], [0, 0, 1, 1], [], []>} : vector<29x16xf32>, vector<16x128xf32>, vector<29x128xf32> -> vector<29x128xf32>
    %c1_14 = arith.constant 1 : index
    %c0_15 = arith.constant 0 : index
    %c0_16 = arith.constant 0 : index
    %13 = vector.load %arg4[%c1_14, %c0_15, %c0_16] : memref<4x29x128xf32, #tpu.memory_space<vmem>>, vector<1x29x128xf32>
    %14 = vector.shape_cast %13 : vector<1x29x128xf32> to vector<29x128xf32>
    %15 = vector.shape_cast %12 : vector<29x128xf32> to vector<1x29x128xf32>
    tpu.vector_store %arg4[%c1_14, %c0_15, %c0_16], %15 {strides = array<i32>} : memref<4x29x128xf32, #tpu.memory_space<vmem>>, vector<1x29x128xf32>,
    %c2 = arith.constant 2 : index
    %c0_17 = arith.constant 0 : index
    %c0_18 = arith.constant 0 : index
    %16 = vector.load %arg3[%c2, %c0_17, %c0_18] : memref<4x16x16xf32, #tpu.memory_space<vmem>>, vector<1x16x16xf32>
    %17 = vector.shape_cast %16 : vector<1x16x16xf32> to vector<16x16xf32>
    %cst_19 = arith.constant dense<0.000000e+00> : vector<16x128xf32>
    %18 = tpu.matmul %17, %1, %cst_19 {dimension_numbers = #tpu.dot_dimension_numbers<[1], [0], [0], [1], [0, 0, 1, 1], [], []>} : vector<16x16xf32>, vector<16x128xf32>, vector<16x128xf32> -> vector<16x128xf32>
    %cst_20 = arith.constant dense<0.000000e+00> : vector<29x128xf32>
    %19 = tpu.matmul %0, %18, %cst_20 {dimension_numbers = #tpu.dot_dimension_numbers<[1], [0], [0], [1], [0, 0, 1, 1], [], []>} : vector<29x16xf32>, vector<16x128xf32>, vector<29x128xf32> -> vector<29x128xf32>
    %c2_21 = arith.constant 2 : index
    %c0_22 = arith.constant 0 : index
    %c0_23 = arith.constant 0 : index
    %20 = vector.load %arg4[%c2_21, %c0_22, %c0_23] : memref<4x29x128xf32, #tpu.memory_space<vmem>>, vector<1x29x128xf32>
    %21 = vector.shape_cast %20 : vector<1x29x128xf32> to vector<29x128xf32>
    %22 = vector.shape_cast %19 : vector<29x128xf32> to vector<1x29x128xf32>
    tpu.vector_store %arg4[%c2_21, %c0_22, %c0_23], %22 {strides = array<i32>} : memref<4x29x128xf32, #tpu.memory_space<vmem>>, vector<1x29x128xf32>,
    %c3 = arith.constant 3 : index
    %c0_24 = arith.constant 0 : index
    %c0_25 = arith.constant 0 : index
    %23 = vector.load %arg3[%c3, %c0_24, %c0_25] : memref<4x16x16xf32, #tpu.memory_space<vmem>>, vector<1x16x16xf32>
    %24 = vector.shape_cast %23 : vector<1x16x16xf32> to vector<16x16xf32>
    %cst_26 = arith.constant dense<0.000000e+00> : vector<16x128xf32>
    %25 = tpu.matmul %24, %1, %cst_26 {dimension_numbers = #tpu.dot_dimension_numbers<[1], [0], [0], [1], [0, 0, 1, 1], [], []>} : vector<16x16xf32>, vector<16x128xf32>, vector<16x128xf32> -> vector<16x128xf32>
    %cst_27 = arith.constant dense<0.000000e+00> : vector<29x128xf32>
    %26 = tpu.matmul %0, %25, %cst_27 {dimension_numbers = #tpu.dot_dimension_numbers<[1], [0], [0], [1], [0, 0, 1, 1], [], []>} : vector<29x16xf32>, vector<16x128xf32>, vector<29x128xf32> -> vector<29x128xf32>
    %c3_28 = arith.constant 3 : index
    %c0_29 = arith.constant 0 : index
    %c0_30 = arith.constant 0 : index
    %27 = vector.load %arg4[%c3_28, %c0_29, %c0_30] : memref<4x29x128xf32, #tpu.memory_space<vmem>>, vector<1x29x128xf32>
    %28 = vector.shape_cast %27 : vector<1x29x128xf32> to vector<29x128xf32>
    %29 = vector.shape_cast %26 : vector<29x128xf32> to vector<1x29x128xf32>
    tpu.vector_store %arg4[%c3_28, %c0_29, %c0_30], %29 {strides = array<i32>} : memref<4x29x128xf32, #tpu.memory_space<vmem>>, vector<1x29x128xf32>,
    return
  }
  func.func @transform_0(%arg0: i32) -> (i32, i32) {
    %c0_i32 = arith.constant 0 : i32
    %c0_i32_0 = arith.constant 0 : i32
    %c0_i32_1 = arith.constant 0 : i32
    return %c0_i32, %c0_i32_0 : i32, i32
  }
  func.func @transform_1(%arg0: i32) -> (i32, i32) {
    %c0_i32 = arith.constant 0 : i32
    %c0_i32_0 = arith.constant 0 : i32
    %c0_i32_1 = arith.constant 0 : i32
    return %c0_i32, %c0_i32_0 : i32, i32
  }
  func.func @transform_2(%arg0: i32) -> (i32, i32, i32) {
    %c0_i32 = arith.constant 0 : i32
    %c0_i32_0 = arith.constant 0 : i32
    %c0_i32_1 = arith.constant 0 : i32
    return %arg0, %c0_i32, %c0_i32_0 : i32, i32, i32
  }
  func.func @transform_3(%arg0: i32) -> (i32, i32, i32) {
    %c0_i32 = arith.constant 0 : i32
    %c0_i32_0 = arith.constant 0 : i32
    %c0_i32_1 = arith.constant 0 : i32
    return %arg0, %c0_i32, %c0_i32_0 : i32, i32, i32
  }
}

</mosaic_0001>

<bundles_post_ra>
// kernel: tpu_custom_call.1
= control target key start
LH: loop header
LB: loop body
LE: loop exit
PB: predicated region body
PF: predicated region fallthrough
CT: control target
= control target key end

     0   :  { %8 = vsyncpa [#allocation3], 0  ;;  %s1485_s0 = inlined_call_operand.vmem [shape: f32[29,16], index: 0, kind: input, shape index: {}]   ;;  %s1486_s1 = inlined_call_operand.vmem [shape: f32[16,128], index: 1, kind: input, shape index: {}]   ;;  %s1487_s2 = inlined_call_operand.hbm [shape: f32[8,16,16], index: 2, kind: input, shape index: {}]   ;;  %s1488_s3 = inlined_call_operand.vmem [shape: f32[8,29,128], index: 3, kind: output, shape index: {}]  }
   0x1   :  { %10 = vsyncpa [#allocation3 + $0x1], 0  ;;  %s1308_s12 = smov 0   ;;  %s1310_s13 = smov 0  }
   0x2   :  { %s1312_s14 = smov 0   ;;  %s1314_s15 = smov 0  }
   0x3 LB: > { %s978_s16 = sadd.s32 4294967295, %s1283_s15   ;;  %s1328_s17 = sadd.s32 1, %s1283_s15   ;;  %s1283_s15 = sphi %s1314_s15, %s1495_s15   ;;  %s1279_s14 = sphi %s1312_s14, %s1494_s14   ;;  %s1275_s13 = sphi %s1310_s13, %s1493_s13   ;;  %s1271_s12 = sphi %s1308_s12, %s1492_s12  }
   0x4   : > { %s62_s18 = ssub.s32 %s1283_s15, %s1328_s17  ;;  %s65_s19 = sadd.s32 1, %s1279_s14 }
   0x5   : > { %p63_p0 = scmp.eq.s32.totalorder %s62_s18, 0  ;;  %p72_p1 = scmp.ne.s32.totalorder %s1279_s14, %s1275_s13 }
   0x6   : > { %p73_p2 = scmp.eq.s32.totalorder %s1283_s15, 0  ;;  %p78_p3 = scmp.ne.s32.totalorder %s1275_s13, %s1271_s12 }
   0x7   : > { %s1338_s20 = scalar_select %p63_p0, %s1279_s14, %s65_s19  }
   0x8   : > { %p74_p4 = por %p73_p2, %p72_p1  ;;  %p79_p5 = scmp.eq.s32.totalorder %s978_s16, 0 }
   0x9   : > { %p1184_p6 = scmp.lt.s32.totalorder %s1283_s15, 2  ;;  %s134_s22 = sand.u32 1, %s1279_s14  }
   0xa   : > { %p1343_p7 = por %p79_p5, %p78_p3  ;;  %s982_s23 = sshll.u32 %s134_s22, 6 }
   0xb   : > { %s1036_s24 = sshll.u32 %s1283_s15, 10  ;;  %s138_s28 = scalar_lea.vmem [#allocation2], %s982_s23 }
   0xc   : > { %s1352_s27 = scalar_lea.hbm %s1487_s2, %s1036_s24  ;;  %s146_s29 = sshll.u32 %s138_s28, 4  ;;  %s1354_s29 = int_to_ptr.vmem [resolvable:$true] %s146_s29 }
   0xd   : > { %p1356_p8 = pnand %p1184_p6, %p74_p4  ;;  %s1361_s4 = scalar_lea.sflag [#allocation3], %s134_s22 }
   0xe   : > { %s1219_s5 = scalar_lea.hbm %s1352_s27, 1024  ;;  %s1224_s8 = scalar_lea.hbm %s1487_s2, 2048 }
   0xf   : > { %p1220_p10 = scmp.ne.s32.totalorder %s1352_s27, %s1219_s5  ;;  %p1221_p11 = pneg %p1356_p8 }
  0x10   : > { %p1225_p0 = scmp.lt.u32.totalorder %s1352_s27, %s1487_s2  ;;  %p1226_p1 = scmp.lt.u32.totalorder %s1224_s8, %s1219_s5 }
  0x11   : > { %p1222_p12 = pnand %p1221_p11, %p1220_p10  ;;  %p1228_p3 = scmp.lt.u32.totalorder %s1219_s5, %s1352_s27 }
  0x12   : > { %p1227_p2 = por %p1226_p1, %p1225_p0 }
  0x13   : > { %p1223_p13 = pneg %p1222_p12 }
  0x14   : > { %p1229_p4 = por %p1228_p3, %p1227_p2 }
  0x16   : > { %p1230_p5 = pnand %p1229_p4, %p1223_p13 }
  0x18   : > { %1233 = shalt.err (!%p1230_p5)
}
  0x19   : > { %s1234_s11 = scalar_lea.vmem %s1354_s29, 1024  ;;  %s1285_s12 = smov [#allocation2]  }
  0x1a   : > { %p1235_p6 = scmp.ne.s32.totalorder %s1354_s29, %s1234_s11  ;;  %s1239_s18 = sshll.u32 %s1285_s12, 4  ;;  %s1240_s18 = int_to_ptr.vmem [resolvable:$false] %s1239_s18 }
  0x1b   : > { %s1241_s19 = scalar_lea.vmem %s1240_s18, 2048  ;;  %p1242_p9 = scmp.lt.s32.totalorder %s1354_s29, %s1240_s18 }
  0x1c   : > { %p1237_p10 = pnand %p1235_p6, %p1221_p11  ;;  %p1243_p0 = scmp.lt.s32.totalorder %s1241_s19, %s1234_s11 }
  0x1e   : > { %p1238_p12 = pneg %p1237_p10  ;;  %p1244_p1 = por %p1243_p0, %p1242_p9 }
  0x20   : > { %p1245_p2 = pnand %p1244_p1, %p1238_p12 }
  0x22   : > { %1248 = shalt.err (!%p1245_p2)
}
  0x23   : > { %s1286_s22 = smov 128   ;;  %s1287_s23 = smov 8  }
  0x24   : > { %1183 = dma.hbm_to_vmem [thread:$0]  (!%p1356_p8), %s1352_s27, 1024, %s1354_s29, %s1361_s4, %s1286_s22, %s1286_s22, %s1287_s23  }
  0x25   : > { %p154_p11 = scmp.lt.s32.totalorder %s1283_s15, 3  ;;  %p1491_p13 = scmp.ge.s32.totalorder %s1283_s15, 1 }
  0x27   : > { %p155_p3 = pnand %p1491_p13, %p154_p11 }
  0x28   : > { %s160_s24 = sand.u32 (!%p155_p3), 1, %s1275_s13  }
  0x29   : > { %158 = sbr.rel (%p155_p3) target bundleno = 720 (0x2d0), region = 32  ;;  %s987_s25 = sshll.u32 (!%p155_p3), %s160_s24, 6 }
  0x2a   : > { %s161_s26 = scalar_lea.sflag (!%p155_p3), [#allocation3], %s160_s24  ;;  %s1393_s28 = scalar_lea.vmem (!%p155_p3), [#allocation2], %s987_s25 }
  0x30   : > { %1266 = dma.done.wait (%p1343_p7), %s161_s26, 1024  }
  0x31   : > { %1268 = vsyncadd (%p1343_p7), %s161_s26, 4294966272  ;;  %vm204_vm0 = vcmask 130048   ;;  %v200_v0 = vld [vmem:[%s1486_s1] sm:$0xff]  ;;  %v201_v1 = vld [vmem:[%s1486_s1 + $0x8] sm:$0xff]  ;;  %s988_s12 = sshll.u32 %s978_s16, 2 }
  0x32   : > { %v202_v2 = vld [vmem:[%s1393_s28] sm:$0xff]  ;;  %v1146_v3 = vpack.c.bf16 %v201_v1, %v200_v0  ;;  %v997_v4 = vld [vmem:[%s1393_s28 + $0x10] sm:$0xff]  ;;  %v203_v5 = vld [vmem:[%s1393_s28 + $0x8] sm:$0xff]  ;;  %p190_p7 = scmp.lt.s32.totalorder %s988_s12, 7 }
  0x33   : > { %1082 = vmatprep.mubr.msk.f32.mxu1 %vm204_vm0, %v202_v2  ;;  %1099 = vmatprep.mubr.msk.f32.mxu0 %vm204_vm0, %v997_v4  ;;  %v998_v6 = vld [vmem:[%s1393_s28 + $0x18] sm:$0xff]  ;;  %v196_v7 = vld [vmem:[%s1485_s0] sm:$0xff]  ;;  %v197_v14 = vld [vmem:[%s1485_s0 + $0x8] sm:$0xff] }
  0x34   : > { %1147 = vmatprep.subr.bf16.mxu1 %v1146_v3  ;;  %1155 = vmatprep.subr.bf16.mxu0 %v1146_v3  ;;  %v198_v15 = vld [vmem:[%s1485_s0 + $0x10] sm:$0xff]  ;;  %v199_v16 = vld [vmem:[%s1485_s0 + $0x18] sm:$0x1f]  ;;  %v1009_v17 = vld [vmem:[%s1393_s28 + $0x20] sm:$0xff]  ;;  %s1497_s12 = smov (!%p190_p7, %s988_s12), 7 }
  0x35   : > { %1149 = vmatpush3.bf16.msra.mxu1 %v1146_v3  ;;  %1157 = vmatpush3.bf16.msra.mxu0 %v1146_v3  ;;  %v1021_v18 = vld [vmem:[%s1393_s28 + $0x30] sm:$0xff]  ;;  %v1010_v19 = vld [vmem:[%s1393_s28 + $0x28] sm:$0xff]  ;;  %v1022_v20 = vld [vmem:[%s1393_s28 + $0x38] sm:$0xff]  ;;  %s1037_s18 = sshll.u32 %s1497_s12, 5 }
  0x36   : > { %s1448_s23 = scalar_lea.vmem %s1488_s3, %s1037_s18 }
  0x38   : > { %1083 = vmatmul.mubr.msk.f32.vlgmr.msra.gmra.mrb[0].mxu1 %vm204_vm0, %v203_v5  ;;  %1100 = vmatmul.mubr.msk.f32.vlgmr.msra.gmra.mrb[0].mxu0 %vm204_vm0, %v998_v6 }
  0x39   : > { %1089 = vmatprep.mubr.msk.f32.mxu1 %vm204_vm0, %v196_v7  ;;  %1106 = vmatprep.mubr.msk.f32.mxu0 %vm204_vm0, %v196_v7 }
 0x10b   : > { %v1084_v8 = vpop.f32.mrb[0].mxu1  ;;  %v1101_v9 = vpop.f32.mrb[0].mxu0 }
 0x10c   : > { %v277_v10 = vpop.f32.mrb[1].mxu1  ;;  %v462_v11 = vpop.f32.mrb[1].mxu0 }
 0x10d   : > { %v1150_v12 = vpack.c.bf16 %v1084_v8, %v277_v10  ;;  %v1158_v13 = vpack.c.bf16 %v1101_v9, %v462_v11 }
 0x10f   : > { %1151 = vmatprep.subr.bf16.mxu1 %v1150_v12  ;;  %1159 = vmatprep.subr.bf16.mxu0 %v1158_v13 }
 0x110   : > { %1153 = vmatpush3.bf16.msra.mxu1 %v1150_v12  ;;  %1161 = vmatpush3.bf16.msra.mxu0 %v1158_v13 }
 0x111   : > { %1163 = vmatprep.subr.bf16.mxu1 %v1146_v3  ;;  %1171 = vmatprep.subr.bf16.mxu0 %v1146_v3 }
 0x113   : > { %1090 = vmatmul.mubr.msk.f32.vlgmr.msra.gmra.mrb[2].mxu1 %vm204_vm0, %v197_v14  ;;  %1107 = vmatmul.mubr.msk.f32.vlgmr.msra.gmra.mrb[2].mxu0 %vm204_vm0, %v197_v14 }
 0x114   : > { %1165 = vmatpush3.bf16.msra.mxu1 %v1146_v3  ;;  %1173 = vmatpush3.bf16.msra.mxu0 %v1146_v3 }
 0x115   : > { %1092 = vmatprep.mubr.msk.f32.mxu1 %vm204_vm0, %v198_v15  ;;  %1109 = vmatprep.mubr.msk.f32.mxu0 %vm204_vm0, %v198_v15 }
 0x117   : > { %1093 = vmatmul.mubr.msk.f32.gmra.mrb[4].mxu1 %vm204_vm0, %v199_v16  ;;  %1110 = vmatmul.mubr.msk.f32.gmra.mrb[4].mxu0 %vm204_vm0, %v199_v16 }
 0x118   : > { %1116 = vmatprep.mubr.msk.f32.mxu1 %vm204_vm0, %v1009_v17  ;;  %1133 = vmatprep.mubr.msk.f32.mxu0 %vm204_vm0, %v1021_v18 }
 0x11b   : > { %1117 = vmatmul.mubr.msk.f32.vlgmr.msra.gmra.mrb[6].mxu1 %vm204_vm0, %v1010_v19  ;;  %1134 = vmatmul.mubr.msk.f32.vlgmr.msra.gmra.mrb[6].mxu0 %vm204_vm0, %v1022_v20 }
 0x11c   : > { %1123 = vmatprep.mubr.msk.f32.mxu1 %vm204_vm0, %v196_v7  ;;  %1140 = vmatprep.mubr.msk.f32.mxu0 %vm204_vm0, %v196_v7 }
 0x1e6   : > { %v1091_v21 = vpop.f32.mrb[2].mxu1  ;;  %v1108_v22 = vpop.f32.mrb[2].mxu0 }
 0x1e7   : > { %384 = vst [vmem:[%s1448_s23 + $0x8] sm:$0xff] %v1091_v21  ;;  %v364_v23 = vpop.f32.mrb[3].mxu1  ;;  %v537_v24 = vpop.f32.mrb[3].mxu0  ;;  %1006 = vst [vmem:[%s1448_s23 + $0x28] sm:$0xff] %v1108_v22 }
 0x1e8   : > { %383 = vst [vmem:[%s1448_s23] sm:$0xff] %v364_v23  ;;  %1005 = vst [vmem:[%s1448_s23 + $0x20] sm:$0xff] %v537_v24 }
 0x1ea   : > { %v1094_v25 = vpop.f32.mrb[4].mxu1  ;;  %v1111_v26 = vpop.f32.mrb[4].mxu0 }
 0x1eb   : > { %386 = vst [vmem:[%s1448_s23 + $0x18] sm:$0x1f] %v1094_v25  ;;  %v374_v27 = vpop.f32.mrb[5].mxu1  ;;  %v547_v28 = vpop.f32.mrb[5].mxu0  ;;  %1008 = vst [vmem:[%s1448_s23 + $0x38] sm:$0x1f] %v1111_v26 }
 0x1ec   : > { %385 = vst [vmem:[%s1448_s23 + $0x10] sm:$0xff] %v374_v27  ;;  %1007 = vst [vmem:[%s1448_s23 + $0x30] sm:$0xff] %v547_v28 }
 0x1ee   : > { %v1118_v29 = vpop.f32.mrb[6].mxu1  ;;  %v1135_v30 = vpop.f32.mrb[6].mxu0 }
 0x1ef   : > { %v636_v31 = vpop.f32.mrb[7].mxu1  ;;  %v810_v32 = vpop.f32.mrb[7].mxu0 }
 0x1f0   : > { %v1166_v33 = vpack.c.bf16 %v1118_v29, %v636_v31  ;;  %v1174_v34 = vpack.c.bf16 %v1135_v30, %v810_v32 }
 0x1f2   : > { %1167 = vmatprep.subr.bf16.mxu1 %v1166_v33  ;;  %1175 = vmatprep.subr.bf16.mxu0 %v1174_v34 }
 0x1f3   : > { %1169 = vmatpush3.bf16.msra.mxu1 %v1166_v33  ;;  %1177 = vmatpush3.bf16.msra.mxu0 %v1174_v34 }
 0x1f6   : > { %1124 = vmatmul.mubr.msk.f32.vlgmr.msra.gmra.mrb[8].mxu1 %vm204_vm0, %v197_v14  ;;  %1141 = vmatmul.mubr.msk.f32.vlgmr.msra.gmra.mrb[8].mxu0 %vm204_vm0, %v197_v14 }
 0x1f7   : > { %1126 = vmatprep.mubr.msk.f32.mxu1 %vm204_vm0, %v198_v15  ;;  %1143 = vmatprep.mubr.msk.f32.mxu0 %vm204_vm0, %v198_v15 }
 0x1fa   : > { %1127 = vmatmul.mubr.msk.f32.gmra.mrb[10].mxu1 %vm204_vm0, %v199_v16  ;;  %1144 = vmatmul.mubr.msk.f32.gmra.mrb[10].mxu0 %vm204_vm0, %v199_v16 }
 0x2c9   : > { %v1125_v35 = vpop.f32.mrb[8].mxu1  ;;  %v1142_v36 = vpop.f32.mrb[8].mxu0 }
 0x2ca   : > { %1018 = vst [vmem:[%s1448_s23 + $0x48] sm:$0xff] %v1125_v35  ;;  %v711_v37 = vpop.f32.mrb[9].mxu1  ;;  %v885_v38 = vpop.f32.mrb[9].mxu0  ;;  %1030 = vst [vmem:[%s1448_s23 + $0x68] sm:$0xff] %v1142_v36 }
 0x2cb   : > { %1017 = vst [vmem:[%s1448_s23 + $0x40] sm:$0xff] %v711_v37  ;;  %1029 = vst [vmem:[%s1448_s23 + $0x60] sm:$0xff] %v885_v38 }
 0x2cd   : > { %v1128_v39 = vpop.f32.mrb[10].mxu1  ;;  %v1145_v40 = vpop.f32.mrb[10].mxu0 }
 0x2ce   : > { %1020 = vst [vmem:[%s1448_s23 + $0x58] sm:$0x1f] %v1128_v39  ;;  %v721_v41 = vpop.f32.mrb[11].mxu1  ;;  %v895_v42 = vpop.f32.mrb[11].mxu0  ;;  %1032 = vst [vmem:[%s1448_s23 + $0x78] sm:$0x1f] %v1145_v40 }
 0x2cf   : > { %1019 = vst [vmem:[%s1448_s23 + $0x50] sm:$0xff] %v721_v41  ;;  %1031 = vst [vmem:[%s1448_s23 + $0x70] sm:$0xff] %v895_v42 }
 0x2d0 PF: > { %p13_p8 = scmp.ge.s32.totalorder %s1328_s17, 4   ;;  %s1492_s12 = smov %s1275_s13 }
 0x2d1   : > { %s1493_s13 = smov %s1279_s14  ;;  %s1494_s14 = smov %s1338_s20 }
 0x2d2   : > { %s1495_s15 = smov %s1328_s17  ;;  %15 = sbr.rel (!%p13_p8) target bundleno = 3 (0x3), region = 78 }
 0x2d9   :  { %933 = vsyncpa [#allocation3], 1 }
 0x2da   :  { %935 = vsyncpa [#allocation3 + $0x1], 1 }

</bundles_post_ra>
